<compile_context>
chip_gen: v6e
topology: v6e:2x2x1
jax: 0.10.0
libtpu: 0.0.40
codegen_flags: <defaults>
</compile_context>

<pallas_src>
import functools

import jax
import jax.numpy as jnp
from jax.experimental import pallas as pl
from jax.experimental.pallas import tpu as pltpu

EPS = 1e-5


# ------------------------------- utilities --------------------------------


def _round_up(n, m):
    return ((n + m - 1) // m) * m


def _pad_dim(d):
    # Lane-dense padding.  256-align large dims (full v6e/v7x MXU passes);
    # 128 alignment is always sufficient on v5e and cheaper for small dims.
    p = _round_up(d, 128)
    if d >= 512 and p % 256 != 0:
        p = _round_up(d, 256)
    return p


def _vmem_limit_bytes():
    # Generation-aware scoped-VMEM budget: ~3/4 of physical VMEM per core
    # (128 MiB on v5e/v6e -> 96 MiB, 64 MiB on v7x -> 48 MiB).
    try:
        cap = int(pltpu.get_tpu_info().vmem_capacity_bytes)
    except Exception:  # non-TPU backend / older jax: conservative fallback
        cap = 64 * 1024 * 1024
    return (cap * 3) // 4


def _pad_matrix(w, rows, cols):
    return (jnp.zeros((rows, cols), jnp.bfloat16)
            .at[:w.shape[0], :w.shape[1]].set(w.astype(jnp.bfloat16)))


def _pad_vector(v, cols):
    return jnp.zeros((cols,), jnp.float32).at[:v.shape[0]].set(v.astype(jnp.float32))


def _pack_rows(cols, *rows):
    # rows: 0 = bias, 1 = gamma, 2 = beta (already padded to `cols`).
    aux = jnp.zeros((8, cols), jnp.float32)
    for r, v in enumerate(rows):
        aux = aux.at[r, :].set(v)
    return aux


def _fused_vmem_bytes(bp, fp, hp, op):
    weights = (fp * hp + hp * hp + hp * op) * 2
    aux = 3 * 8 * max(hp, op) * 4
    io = bp * fp * 2 + bp * op * 4
    temps = 4 * bp * hp * 4            # f32 temporaries inside the fused body
    return weights + aux + io + temps


def _tiled_stage_vmem_bytes(tb, fp, hp, op):
    bf, f = 2, 4
    s1 = (2 * tb * fp * bf + fp * hp * bf + 8 * hp * f
          + 2 * tb * hp * bf + 2 * 8 * hp * f + tb * hp * f)
    s2 = (2 * tb * hp * bf + 8 * hp * f + hp * hp * bf + 8 * hp * f
          + 2 * tb * hp * bf + 2 * 8 * hp * f + 2 * tb * hp * f)
    s3 = (2 * tb * hp * bf + 8 * hp * f + hp * op * bf + 8 * op * f
          + 2 * tb * op * f + tb * hp * f + tb * op * f)
    return max(s1, s2, s3)


# ----------------------------- kernel bodies -------------------------------


def _write_stats_rows(stats_ref, hm):
    stats_ref[0:1, :] = jnp.sum(hm, axis=0, keepdims=True)
    stats_ref[1:2, :] = jnp.sum(hm * hm, axis=0, keepdims=True)


def _emit_stats(stats_ref, h, *, batch, tb, needs_mask):
    """Write per-tile (sum, sumsq) partials; mask padded rows on the last tile only."""
    if needs_mask:
        i = pl.program_id(0)
        last = pl.num_programs(0) - 1

        @pl.when(i == last)
        def _():
            row = jax.lax.broadcasted_iota(jnp.int32, (tb, 1), 0) + i * tb
            hm = jnp.where(row < batch, h, 0.0)
            _write_stats_rows(stats_ref, hm)

        @pl.when(i != last)
        def _():
            _write_stats_rows(stats_ref, h)
    else:
        _write_stats_rows(stats_ref, h)


def _linear_stats_kernel(x_ref, w_ref, aux_ref, h_ref, stats_ref, *,
                         batch, tb, needs_mask):
    """h = x @ W1 + b1 per batch tile; emit BN1 partial statistics (f32)."""
    h = jnp.dot(x_ref[...], w_ref[...], preferred_element_type=jnp.float32)
    h = h + aux_ref[0:1, :]                               # bias (row 0)
    h_ref[...] = h.astype(h_ref.dtype)                    # bf16 intermediate
    _emit_stats(stats_ref, h, batch=batch, tb=tb, needs_mask=needs_mask)


def _bn_relu_linear_stats_kernel(h_ref, aff_ref, w_ref, aux_ref,
                                 h_out_ref, stats_ref, *, batch, tb, needs_mask):
    """Apply precomputed BN affine -> ReLU -> Linear; emit next BN partials."""
    a = jnp.maximum(h_ref[...].astype(jnp.float32) * aff_ref[0:1, :]
                    + aff_ref[1:2, :], 0.0)
    h2 = jnp.dot(a.astype(jnp.bfloat16), w_ref[...],
                 preferred_element_type=jnp.float32)
    h2 = h2 + aux_ref[0:1, :]
    h_out_ref[...] = h2.astype(h_out_ref.dtype)           # bf16 intermediate
    _emit_stats(stats_ref, h2, batch=batch, tb=tb, needs_mask=needs_mask)


def _bn_relu_linear_relu_kernel(h_ref, aff_ref, w_ref, aux_ref, o_ref):
    """Final stage: BN2 affine -> ReLU -> Linear3 -> ReLU."""
    a = jnp.maximum(h_ref[...].astype(jnp.float32) * aff_ref[0:1, :]
                    + aff_ref[1:2, :], 0.0)
    out = jnp.dot(a.astype(jnp.bfloat16), w_ref[...],
                  preferred_element_type=jnp.float32)
    out = out + aux_ref[0:1, :]
    o_ref[...] = jnp.maximum(out, 0.0)


def _fused_mlp_kernel(x_ref, w1_ref, w2_ref, w3_ref, aux1_ref, aux2_ref,
                      aux3_ref, o_ref, *, batch, needs_mask):
    """All three layers in one kernel; activations never leave VMEM."""
    f32 = jnp.float32
    inv_n = 1.0 / batch

    def bn_relu(h, aux_ref):
        if needs_mask:
            row = jax.lax.broadcasted_iota(jnp.int32, (h.shape[0], 1), 0)
            hm = jnp.where(row < batch, h, 0.0)
        else:
            hm = h
        mean = jnp.sum(hm, axis=0, keepdims=True) * inv_n
        var = jnp.sum(hm * hm, axis=0, keepdims=True) * inv_n - mean * mean
        scale = aux_ref[1:2, :] * jax.lax.rsqrt(var + EPS)   # gamma (row 1)
        shift = aux_ref[2:3, :] - mean * scale               # beta  (row 2)
        return jnp.maximum(h * scale + shift, 0.0)

    h = jnp.dot(x_ref[...], w1_ref[...], preferred_element_type=f32) + aux1_ref[0:1, :]
    a = bn_relu(h, aux1_ref)
    h = jnp.dot(a.astype(jnp.bfloat16), w2_ref[...],
                preferred_element_type=f32) + aux2_ref[0:1, :]
    a = bn_relu(h, aux2_ref)
    h = jnp.dot(a.astype(jnp.bfloat16), w3_ref[...],
                preferred_element_type=f32) + aux3_ref[0:1, :]
    o_ref[...] = jnp.maximum(h, 0.0)


# ------------------------------ host wrappers ------------------------------


def _bn_affine_from_stats(stats_partials, gamma_p, beta_p, n):
    """Reduce per-tile (sum, sumsq) partials -> packed (8, C) scale/shift."""
    cols = stats_partials.shape[-1]
    sp = stats_partials.reshape(-1, 8, cols)
    s = jnp.sum(sp[:, 0, :], axis=0)
    ss = jnp.sum(sp[:, 1, :], axis=0)
    inv_n = 1.0 / n
    mean = s * inv_n
    var = ss * inv_n - mean * mean
    scale = gamma_p * jax.lax.rsqrt(var + EPS)
    shift = beta_p - mean * scale
    aff = jnp.zeros((8, cols), jnp.float32)
    return aff.at[0, :].set(scale).at[1, :].set(shift)


def _forward_fused(xp, w1p, w2p, w3p, aux1, aux2, aux3, *, batch, vmem_limit):
    Bp, Fp = xp.shape
    Hp = w1p.shape[1]
    Op = w3p.shape[1]
    needs_mask = Bp != batch
    flops = 2 * Bp * (Fp * Hp + Hp * Hp + Hp * Op) + 10 * Bp * Hp
    nbytes = (int(xp.size) * 2 + (int(w1p.size) + int(w2p.size) + int(w3p.size)) * 2
              + (int(aux1.size) + int(aux2.size) + int(aux3.size)) * 4 + Bp * Op * 4)
    return pl.pallas_call(
        functools.partial(_fused_mlp_kernel, batch=batch, needs_mask=needs_mask),
        out_shape=jax.ShapeDtypeStruct((Bp, Op), jnp.float32),
        compiler_params=pltpu.CompilerParams(vmem_limit_bytes=vmem_limit),
        cost_estimate=pl.CostEstimate(flops=int(flops), transcendentals=2 * Hp,
                                      bytes_accessed=int(nbytes)),
    )(xp, w1p, w2p, w3p, aux1, aux2, aux3)


def _forward_tiled(x, w1p, w2p, w3p, aux1, aux2, aux3,
                   g1p, be1p, g2p, be2p, *, batch, block_b, vmem_limit):
    bf16, f32 = jnp.bfloat16, jnp.float32
    Fp, Hp = w1p.shape
    Op = w3p.shape[1]

    # Batch tile: multiple of 16 (bf16 sublane packing), shrunk until the
    # largest stage's working set fits the scoped-VMEM budget (v7x-safe).
    TB = min(_round_up(block_b, 16), _round_up(batch, 16))
    while TB > 16 and _tiled_stage_vmem_bytes(TB, Fp, Hp, Op) > int(0.8 * vmem_limit):
        TB = max(16, _round_up(TB // 2, 16))
    Bp = _round_up(batch, TB)
    nb = Bp // TB
    needs_mask = Bp != batch

    xp = jnp.zeros((Bp, Fp), bf16).at[:batch, :x.shape[1]].set(x.astype(bf16))

    cp = pltpu.CompilerParams(dimension_semantics=("parallel",),
                              vmem_limit_bytes=vmem_limit)

    def tile_spec(cols):
        return pl.BlockSpec((TB, cols), lambda i: (i, 0))

    def stats_spec(cols):
        return pl.BlockSpec((8, cols), lambda i: (i, 0))

    def resident_spec(rows, cols):
        # Constant-index operands never need a second pipeline buffer.
        try:
            return pl.BlockSpec((rows, cols), lambda i: (0, 0),
                                pipeline_mode=pl.Buffered(buffer_count=1))
        except (TypeError, AttributeError):
            return pl.BlockSpec((rows, cols), lambda i: (0, 0))

    def cost(flops, nbytes):
        return pl.CostEstimate(flops=int(flops), transcendentals=0,
                               bytes_accessed=int(nbytes))

    # ---- stage 1: Linear1 (+ bias) and per-tile BN1 partial stats ----
    h1, st1 = pl.pallas_call(
        functools.partial(_linear_stats_kernel,
                          batch=batch, tb=TB, needs_mask=needs_mask),
        out_shape=(jax.ShapeDtypeStruct((Bp, Hp), bf16),
                   jax.ShapeDtypeStruct((nb * 8, Hp), f32)),
        grid=(nb,),
        in_specs=[tile_spec(Fp), resident_spec(Fp, Hp), resident_spec(8, Hp)],
        out_specs=(tile_spec(Hp), stats_spec(Hp)),
        compiler_params=cp,
        cost_estimate=cost(2 * Bp * Fp * Hp,
                           Bp * Fp * 2 + Fp * Hp * 2 + 8 * Hp * 4
                           + Bp * Hp * 2 + nb * 8 * Hp * 4),
    )(xp, w1p, aux1)

    aff1 = _bn_affine_from_stats(st1, g1p, be1p, batch)

    # ---- stage 2: BN1 affine -> ReLU -> Linear2 and BN2 partial stats ----
    h2, st2 = pl.pallas_call(
        functools.partial(_bn_relu_linear_stats_kernel,
                          batch=batch, tb=TB, needs_mask=needs_mask),
        out_shape=(jax.ShapeDtypeStruct((Bp, Hp), bf16),
                   jax.ShapeDtypeStruct((nb * 8, Hp), f32)),
        grid=(nb,),
        in_specs=[tile_spec(Hp), resident_spec(8, Hp),
                  resident_spec(Hp, Hp), resident_spec(8, Hp)],
        out_specs=(tile_spec(Hp), stats_spec(Hp)),
        compiler_params=cp,
        cost_estimate=cost(2 * Bp * Hp * Hp + 4 * Bp * Hp,
                           Bp * Hp * 2 + 8 * Hp * 4 + Hp * Hp * 2 + 8 * Hp * 4
                           + Bp * Hp * 2 + nb * 8 * Hp * 4),
    )(h1, aff1, w2p, aux2)

    aff2 = _bn_affine_from_stats(st2, g2p, be2p, batch)

    # ---- stage 3: BN2 affine -> ReLU -> Linear3 -> ReLU ----
    out_p = pl.pallas_call(
        _bn_relu_linear_relu_kernel,
        out_shape=jax.ShapeDtypeStruct((Bp, Op), f32),
        grid=(nb,),
        in_specs=[tile_spec(Hp), resident_spec(8, Hp),
                  resident_spec(Hp, Op), resident_spec(8, Op)],
        out_specs=tile_spec(Op),
        compiler_params=cp,
        cost_estimate=cost(2 * Bp * Hp * Op + 4 * Bp * Hp,
                           Bp * Hp * 2 + 8 * Hp * 4 + Hp * Op * 2 + 8 * Op * 4
                           + Bp * Op * 4),
    )(h2, aff2, w3p, aux3)

    return out_p


def mlp_forward(x, params, *, block_b=512, mode="auto"):
    """Forward pass.  x: (B, input_size) f32 -> (B, output_size) f32.

    mode: "auto" (fuse all three layers into one kernel when the working set
    fits comfortably in VMEM, else pipeline batch tiles across three fused
    pallas_calls), "fused", or "tiled".
    """
    if mode not in ("auto", "fused", "tiled"):
        raise ValueError(mode)
    w1, b1, g1, be1, w2, b2, g2, be2, w3, b3 = params
    B, F = x.shape
    H = w1.shape[1]
    O = w3.shape[1]
    Fp, Hp, Op = _pad_dim(F), _pad_dim(H), _pad_dim(O)
    vmem_limit = _vmem_limit_bytes()
    bf16 = jnp.bfloat16

    w1p = _pad_matrix(w1, Fp, Hp)
    w2p = _pad_matrix(w2, Hp, Hp)
    w3p = _pad_matrix(w3, Hp, Op)
    b1p, g1p, be1p = (_pad_vector(v, Hp) for v in (b1, g1, be1))
    b2p, g2p, be2p = (_pad_vector(v, Hp) for v in (b2, g2, be2))
    b3p = _pad_vector(b3, Op)
    aux1 = _pack_rows(Hp, b1p, g1p, be1p)
    aux2 = _pack_rows(Hp, b2p, g2p, be2p)
    aux3 = _pack_rows(Op, b3p)

    Bp_f = _round_up(B, 16)
    use_fused = mode == "fused" or (
        mode == "auto"
        and _fused_vmem_bytes(Bp_f, Fp, Hp, Op) <= vmem_limit // 2)

    if use_fused:
        xp = jnp.zeros((Bp_f, Fp), bf16).at[:B, :F].set(x.astype(bf16))
        out_p = _forward_fused(xp, w1p, w2p, w3p, aux1, aux2, aux3,
                               batch=B, vmem_limit=vmem_limit)
    else:
        out_p = _forward_tiled(x, w1p, w2p, w3p, aux1, aux2, aux3,
                               g1p, be1p, g2p, be2p,
                               batch=B, block_b=block_b, vmem_limit=vmem_limit)
    return out_p[:B, :O]


# ----------------------------- init / reference ----------------------------


def init_params(key, input_size, hidden_size, output_size):
    """PyTorch-like uniform init; BN gamma=1, beta=0."""
    ks = jax.random.split(key, 6)

    def linear(kw, kb, fan_in, fan_out):
        bound = 1.0 / jnp.sqrt(jnp.float32(fan_in))
        w = jax.random.uniform(kw, (fan_in, fan_out), jnp.float32, -bound, bound)
        b = jax.random.uniform(kb, (fan_out,), jnp.float32, -bound, bound)
        return w, b

    w1, b1 = linear(ks[0], ks[1], input_size, hidden_size)
    w2, b2 = linear(ks[2], ks[3], hidden_size, hidden_size)
    w3, b3 = linear(ks[4], ks[5], hidden_size, output_size)
    g1 = jnp.ones((hidden_size,), jnp.float32)
    be1 = jnp.zeros((hidden_size,), jnp.float32)
    g2 = jnp.ones((hidden_size,), jnp.float32)
    be2 = jnp.zeros((hidden_size,), jnp.float32)
    return (w1, b1, g1, be1, w2, b2, g2, be2, w3, b3)


def mlp_ref(x, params, *, bf16_intermediates):
    """Pure-JAX reference mirroring the kernel numerics.

    bf16_intermediates=True matches the tiled path (h stored as bf16 between
    stages; BN stats from f32 h, BN affine applied to the bf16-rounded h);
    False matches the fused path (h stays f32 inside VMEM).
    """
    w1, b1, g1, be1, w2, b2, g2, be2, w3, b3 = params
    n = x.shape[0]
    inv_n = 1.0 / n
    bf16, f32 = jnp.bfloat16, jnp.float32

    def dot(a, w):
        return jnp.dot(a.astype(bf16), w.astype(bf16), preferred_element_type=f32)

    def bn_relu(h, g, be):
        mean = jnp.sum(h, 0, keepdims=True) * inv_n
        var = jnp.sum(h * h, 0, keepdims=True) * inv_n - mean * mean
        scale = g.reshape(1, -1) * jax.lax.rsqrt(var + EPS)
        shift = be.reshape(1, -1) - mean * scale
        ha = h.astype(bf16).astype(f32) if bf16_intermediates else h
        return jnp.maximum(ha * scale + shift, 0.0)

    h = dot(x, w1) + b1.reshape(1, -1)
    a = bn_relu(h, g1, be1)
    h = dot(a, w2) + b2.reshape(1, -1)
    a = bn_relu(h, g2, be2)
    h = dot(a, w3) + b3.reshape(1, -1)
    return jnp.maximum(h, 0.0)


if __name__ == "__main__":
    key = jax.random.PRNGKey(0)
    k_x, k_p = jax.random.split(key)

    batch, input_size, hidden_size, output_size = 20, 16, 32, 8
    x = jax.random.normal(k_x, (batch, input_size), jnp.float32)
    params = init_params(k_p, input_size, hidden_size, output_size)

    # Fused single-kernel path (auto-selected at these small sizes).
    out_fused = jax.block_until_ready(mlp_forward(x, params))
    ref_f32 = mlp_ref(x, params, bf16_intermediates=False)
    assert out_fused.shape == (batch, output_size)
    assert jnp.allclose(out_fused, ref_f32, atol=2e-3, rtol=2e-3), \
        float(jnp.max(jnp.abs(out_fused - ref_f32)))

    # Tiled three-stage path: block_b=16 forces two batch tiles so the
    # parallel per-tile stats, masked last tile, bf16 intermediates and the
    # wrapper-side BN-affine reduction are all exercised.
    out_tiled = jax.block_until_ready(mlp_forward(x, params, mode="tiled", block_b=16))
    ref_bf16 = mlp_ref(x, params, bf16_intermediates=True)
    assert out_tiled.shape == (batch, output_size)
    assert jnp.allclose(out_tiled, ref_bf16, atol=2e-3, rtol=2e-3), \
        float(jnp.max(jnp.abs(out_tiled - ref_bf16)))

    print("KERNEL_OK")
</pallas_src>

<mosaic_0001>
module attributes {stable_mosaic.version = 11 : i64} {
  func.func @_fused_mlp_kernel(%arg0: memref<32x128xbf16, #tpu.memory_space<vmem>>, %arg1: memref<128x128xbf16, #tpu.memory_space<vmem>>, %arg2: memref<128x128xbf16, #tpu.memory_space<vmem>>, %arg3: memref<128x128xbf16, #tpu.memory_space<vmem>>, %arg4: memref<8x128xf32, #tpu.memory_space<vmem>>, %arg5: memref<8x128xf32, #tpu.memory_space<vmem>>, %arg6: memref<8x128xf32, #tpu.memory_space<vmem>>, %arg7: memref<32x128xf32, #tpu.memory_space<vmem>>) attributes {dimension_semantics = [], scalar_prefetch = 0 : i64, scratch_operands = 0 : i64, tpu.core_type = #tpu.core_type<tc>} {
    %c0 = arith.constant 0 : index
    %c0_0 = arith.constant 0 : index
    %0 = vector.load %arg0[%c0, %c0_0] : memref<32x128xbf16, #tpu.memory_space<vmem>>, vector<32x128xbf16>
    %c0_1 = arith.constant 0 : index
    %c0_2 = arith.constant 0 : index
    %1 = vector.load %arg1[%c0_1, %c0_2] : memref<128x128xbf16, #tpu.memory_space<vmem>>, vector<128x128xbf16>
    %cst = arith.constant dense<0.000000e+00> : vector<32x128xf32>
    %2 = tpu.matmul %0, %1, %cst {dimension_numbers = #tpu.dot_dimension_numbers<[1], [0], [0], [1], [0, 0, 1, 1], [], []>} : vector<32x128xbf16>, vector<128x128xbf16>, vector<32x128xf32> -> vector<32x128xf32>
    %c0_3 = arith.constant 0 : index
    %c0_4 = arith.constant 0 : index
    %3 = vector.load %arg4[%c0_3, %c0_4] : memref<8x128xf32, #tpu.memory_space<vmem>>, vector<1x128xf32>
    %4 = vector.broadcast %3 : vector<1x128xf32> to vector<32x128xf32>
    %5 = arith.addf %2, %4 : vector<32x128xf32>
    %6 = tpu.iota {dimensions = array<i32: 0>} : vector<32x1xi32>
    %c20_i32 = arith.constant 20 : i32
    %7 = vector.broadcast %c20_i32 : i32 to vector<32x1xi32>
    %8 = arith.cmpi slt, %6, %7 : vector<32x1xi32>
    %cst_5 = arith.constant 0.000000e+00 : f32
    %9 = vector.shape_cast %8 : vector<32x1xi1> to vector<32x1xi1>
    %10 = vector.broadcast %9 : vector<32x1xi1> to vector<32x128xi1>
    %11 = vector.broadcast %cst_5 : f32 to vector<32x128xf32>
    %12 = arith.select %10, %5, %11 : vector<32x128xi1>, vector<32x128xf32>
    %cst_6 = arith.constant dense<0.000000e+00> : vector<128xf32>
    %13 = vector.multi_reduction <add>, %12, %cst_6 [0] : vector<32x128xf32> to vector<128xf32>
    %14 = vector.shape_cast %13 : vector<128xf32> to vector<1x128xf32>
    %cst_7 = arith.constant 5.000000e-02 : f32
    %15 = vector.broadcast %cst_7 : f32 to vector<1x128xf32>
    %16 = arith.mulf %14, %15 : vector<1x128xf32>
    %17 = arith.mulf %12, %12 : vector<32x128xf32>
    %cst_8 = arith.constant dense<0.000000e+00> : vector<128xf32>
    %18 = vector.multi_reduction <add>, %17, %cst_8 [0] : vector<32x128xf32> to vector<128xf32>
    %19 = vector.shape_cast %18 : vector<128xf32> to vector<1x128xf32>
    %cst_9 = arith.constant 5.000000e-02 : f32
    %20 = vector.broadcast %cst_9 : f32 to vector<1x128xf32>
    %21 = arith.mulf %19, %20 : vector<1x128xf32>
    %22 = arith.mulf %16, %16 : vector<1x128xf32>
    %23 = arith.subf %21, %22 : vector<1x128xf32>
    %c1 = arith.constant 1 : index
    %c0_10 = arith.constant 0 : index
    %24 = vector.load %arg4[%c1, %c0_10] : memref<8x128xf32, #tpu.memory_space<vmem>>, vector<1x128xf32>
    %cst_11 = arith.constant 9.99999974E-6 : f32
    %25 = vector.broadcast %cst_11 : f32 to vector<1x128xf32>
    %26 = arith.addf %23, %25 : vector<1x128xf32>
    %27 = math.rsqrt %26 : vector<1x128xf32>
    %28 = arith.mulf %24, %27 : vector<1x128xf32>
    %c2 = arith.constant 2 : index
    %c0_12 = arith.constant 0 : index
    %29 = vector.load %arg4[%c2, %c0_12] : memref<8x128xf32, #tpu.memory_space<vmem>>, vector<1x128xf32>
    %30 = arith.mulf %16, %28 : vector<1x128xf32>
    %31 = arith.subf %29, %30 : vector<1x128xf32>
    %32 = vector.broadcast %28 : vector<1x128xf32> to vector<32x128xf32>
    %33 = arith.mulf %5, %32 : vector<32x128xf32>
    %34 = vector.broadcast %31 : vector<1x128xf32> to vector<32x128xf32>
    %35 = arith.addf %33, %34 : vector<32x128xf32>
    %cst_13 = arith.constant 0.000000e+00 : f32
    %36 = vector.broadcast %cst_13 : f32 to vector<32x128xf32>
    %37 = arith.maximumf %35, %36 : vector<32x128xf32>
    %38 = arith.truncf %37 : vector<32x128xf32> to vector<32x128xbf16>
    %c0_14 = arith.constant 0 : index
    %c0_15 = arith.constant 0 : index
    %39 = vector.load %arg2[%c0_14, %c0_15] : memref<128x128xbf16, #tpu.memory_space<vmem>>, vector<128x128xbf16>
    %cst_16 = arith.constant dense<0.000000e+00> : vector<32x128xf32>
    %40 = tpu.matmul %38, %39, %cst_16 {dimension_numbers = #tpu.dot_dimension_numbers<[1], [0], [0], [1], [0, 0, 1, 1], [], []>} : vector<32x128xbf16>, vector<128x128xbf16>, vector<32x128xf32> -> vector<32x128xf32>
    %c0_17 = arith.constant 0 : index
    %c0_18 = arith.constant 0 : index
    %41 = vector.load %arg5[%c0_17, %c0_18] : memref<8x128xf32, #tpu.memory_space<vmem>>, vector<1x128xf32>
    %42 = vector.broadcast %41 : vector<1x128xf32> to vector<32x128xf32>
    %43 = arith.addf %40, %42 : vector<32x128xf32>
    %44 = tpu.iota {dimensions = array<i32: 0>} : vector<32x1xi32>
    %c20_i32_19 = arith.constant 20 : i32
    %45 = vector.broadcast %c20_i32_19 : i32 to vector<32x1xi32>
    %46 = arith.cmpi slt, %44, %45 : vector<32x1xi32>
    %cst_20 = arith.constant 0.000000e+00 : f32
    %47 = vector.shape_cast %46 : vector<32x1xi1> to vector<32x1xi1>
    %48 = vector.broadcast %47 : vector<32x1xi1> to vector<32x128xi1>
    %49 = vector.broadcast %cst_20 : f32 to vector<32x128xf32>
    %50 = arith.select %48, %43, %49 : vector<32x128xi1>, vector<32x128xf32>
    %cst_21 = arith.constant dense<0.000000e+00> : vector<128xf32>
    %51 = vector.multi_reduction <add>, %50, %cst_21 [0] : vector<32x128xf32> to vector<128xf32>
    %52 = vector.shape_cast %51 : vector<128xf32> to vector<1x128xf32>
    %cst_22 = arith.constant 5.000000e-02 : f32
    %53 = vector.broadcast %cst_22 : f32 to vector<1x128xf32>
    %54 = arith.mulf %52, %53 : vector<1x128xf32>
    %55 = arith.mulf %50, %50 : vector<32x128xf32>
    %cst_23 = arith.constant dense<0.000000e+00> : vector<128xf32>
    %56 = vector.multi_reduction <add>, %55, %cst_23 [0] : vector<32x128xf32> to vector<128xf32>
    %57 = vector.shape_cast %56 : vector<128xf32> to vector<1x128xf32>
    %cst_24 = arith.constant 5.000000e-02 : f32
    %58 = vector.broadcast %cst_24 : f32 to vector<1x128xf32>
    %59 = arith.mulf %57, %58 : vector<1x128xf32>
    %60 = arith.mulf %54, %54 : vector<1x128xf32>
    %61 = arith.subf %59, %60 : vector<1x128xf32>
    %c1_25 = arith.constant 1 : index
    %c0_26 = arith.constant 0 : index
    %62 = vector.load %arg5[%c1_25, %c0_26] : memref<8x128xf32, #tpu.memory_space<vmem>>, vector<1x128xf32>
    %cst_27 = arith.constant 9.99999974E-6 : f32
    %63 = vector.broadcast %cst_27 : f32 to vector<1x128xf32>
    %64 = arith.addf %61, %63 : vector<1x128xf32>
    %65 = math.rsqrt %64 : vector<1x128xf32>
    %66 = arith.mulf %62, %65 : vector<1x128xf32>
    %c2_28 = arith.constant 2 : index
    %c0_29 = arith.constant 0 : index
    %67 = vector.load %arg5[%c2_28, %c0_29] : memref<8x128xf32, #tpu.memory_space<vmem>>, vector<1x128xf32>
    %68 = arith.mulf %54, %66 : vector<1x128xf32>
    %69 = arith.subf %67, %68 : vector<1x128xf32>
    %70 = vector.broadcast %66 : vector<1x128xf32> to vector<32x128xf32>
    %71 = arith.mulf %43, %70 : vector<32x128xf32>
    %72 = vector.broadcast %69 : vector<1x128xf32> to vector<32x128xf32>
    %73 = arith.addf %71, %72 : vector<32x128xf32>
    %cst_30 = arith.constant 0.000000e+00 : f32
    %74 = vector.broadcast %cst_30 : f32 to vector<32x128xf32>
    %75 = arith.maximumf %73, %74 : vector<32x128xf32>
    %76 = arith.truncf %75 : vector<32x128xf32> to vector<32x128xbf16>
    %c0_31 = arith.constant 0 : index
    %c0_32 = arith.constant 0 : index
    %77 = vector.load %arg3[%c0_31, %c0_32] : memref<128x128xbf16, #tpu.memory_space<vmem>>, vector<128x128xbf16>
    %cst_33 = arith.constant dense<0.000000e+00> : vector<32x128xf32>
    %78 = tpu.matmul %76, %77, %cst_33 {dimension_numbers = #tpu.dot_dimension_numbers<[1], [0], [0], [1], [0, 0, 1, 1], [], []>} : vector<32x128xbf16>, vector<128x128xbf16>, vector<32x128xf32> -> vector<32x128xf32>
    %c0_34 = arith.constant 0 : index
    %c0_35 = arith.constant 0 : index
    %79 = vector.load %arg6[%c0_34, %c0_35] : memref<8x128xf32, #tpu.memory_space<vmem>>, vector<1x128xf32>
    %80 = vector.broadcast %79 : vector<1x128xf32> to vector<32x128xf32>
    %81 = arith.addf %78, %80 : vector<32x128xf32>
    %cst_36 = arith.constant 0.000000e+00 : f32
    %82 = vector.broadcast %cst_36 : f32 to vector<32x128xf32>
    %83 = arith.maximumf %81, %82 : vector<32x128xf32>
    %c0_37 = arith.constant 0 : index
    %c0_38 = arith.constant 0 : index
    %84 = vector.load %arg7[%c0_37, %c0_38] : memref<32x128xf32, #tpu.memory_space<vmem>>, vector<32x128xf32>
    tpu.vector_store %arg7[%c0_37, %c0_38], %83 {strides = array<i32>} : memref<32x128xf32, #tpu.memory_space<vmem>>, vector<32x128xf32>,
    return
  }
}

</mosaic_0001>

<bundles_post_ra>
// kernel: tpu_custom_call.1
= control target key start
LH: loop header
LB: loop body
LE: loop exit
PB: predicated region body
PF: predicated region fallthrough
CT: control target
= control target key end

     0   :  { %12 = vsyncpa [#allocation3], 0  ;;  %s1055_s0 = inlined_call_operand.hbm [shape: bf16[32,128], index: 0, kind: input, shape index: {}]   ;;  %s1056_s1 = inlined_call_operand.hbm [shape: bf16[128,128], index: 1, kind: input, shape index: {}]   ;;  %s1057_s2 = inlined_call_operand.hbm [shape: bf16[128,128], index: 2, kind: input, shape index: {}]   ;;  %s1058_s3 = inlined_call_operand.hbm [shape: bf16[128,128], index: 3, kind: input, shape index: {}]   ;;  %s1059_s4 = inlined_call_operand.hbm [shape: f32[8,128], index: 4, kind: input, shape index: {}]   ;;  %s1060_s5 = inlined_call_operand.vmem [shape: f32[8,128], index: 5, kind: input, shape index: {}]   ;;  %s1061_s6 = inlined_call_operand.hbm [shape: f32[8,128], index: 6, kind: input, shape index: {}]   ;;  %s1062_s7 = inlined_call_operand.hbm [shape: f32[32,128], index: 7, kind: output, shape index: {}]  }
   0x1   :  { %13 = vsyncpa [#allocation6], 0 }
   0x2   :  { %14 = vsyncpa [#allocation9], 0 }
   0x3   :  { %15 = vsyncpa [#allocation12], 0 }
   0x4   :  { %16 = vsyncpa [#allocation4], 0  ;;  %s949_s24 = smov [#allocation5]   ;;  %s950_s26 = smov [#allocation8]  }
   0x5   :  { %s34_s25 = sshll.u32 %s949_s24, 4  ;;  %s58_s27 = sshll.u32 %s950_s26, 4  ;;  %s35_s25 = int_to_ptr.vmem [resolvable:$true] %s34_s25  ;;  %s59_s27 = int_to_ptr.vmem [resolvable:$true] %s58_s27 }
   0x6   :  { %s807_s28 = scalar_lea.vmem %s35_s25, 1024  ;;  %p812_p1 = scmp.lt.s32.totalorder %s35_s25, %s35_s25 }
   0x7   :  { %p808_p0 = scmp.ne.s32.totalorder %s35_s25, %s807_s28  ;;  %p813_p2 = scmp.lt.s32.totalorder %s807_s28, %s807_s28 }
   0x9   :  { %p814_p3 = por %p813_p2, %p812_p1 }
   0xb   :  { %p815_p4 = pnand %p814_p3, %p808_p0 }
   0xd   :  { %818 = shalt.err (!%p815_p4)
}
   0xe   :  { %s951_s29 = smov 64   ;;  %s952_s30 = smov 4  }
   0xf   :  { %40 = dma.hbm_to_vmem [thread:$0]  %s1056_s1, 1024, %s35_s25, [#allocation6], %s951_s29, %s951_s29, %s952_s30  }
  0x10   :  { %s827_s10 = scalar_lea.vmem %s59_s27, 1024  ;;  %p832_p6 = scmp.lt.s32.totalorder %s59_s27, %s59_s27 }
  0x11   :  { %p828_p5 = scmp.ne.s32.totalorder %s59_s27, %s827_s10  ;;  %p833_p7 = scmp.lt.s32.totalorder %s827_s10, %s827_s10 }
  0x13   :  { %p834_p8 = por %p833_p7, %p832_p6 }
  0x15   :  { %p835_p9 = pnand %p834_p8, %p828_p5 }
  0x17   :  { %838 = shalt.err (!%p835_p9)
}
  0x18   :  { %64 = dma.hbm_to_vmem [thread:$0]  %s1058_s3, 1024, %s59_s27, [#allocation9], %s951_s29, %s951_s29, %s952_s30  }
  0x19   :  { %s953_s13 = smov [#allocation2]   ;;  %s954_s15 = smov [#allocation7]  }
  0x1a   :  { %s22_s14 = sshll.u32 %s953_s13, 4  ;;  %s46_s16 = sshll.u32 %s954_s15, 4  ;;  %s23_s14 = int_to_ptr.vmem [resolvable:$true] %s22_s14  ;;  %s47_s16 = int_to_ptr.vmem [resolvable:$true] %s46_s16 }
  0x1b   :  { %s847_s1 = scalar_lea.vmem %s23_s14, 256  ;;  %p852_p11 = scmp.lt.s32.totalorder %s23_s14, %s23_s14 }
  0x1c   :  { %p848_p10 = scmp.ne.s32.totalorder %s23_s14, %s847_s1  ;;  %p853_p12 = scmp.lt.s32.totalorder %s847_s1, %s847_s1 }
  0x1e   :  { %p854_p13 = por %p853_p12, %p852_p11 }
  0x20   :  { %p855_p0 = pnand %p854_p13, %p848_p10 }
  0x22   :  { %858 = shalt.err (!%p855_p0)
}
  0x23   :  { %28 = dma.hbm_to_vmem [thread:$0]  %s1055_s0, 256, %s23_s14, [#allocation3], %s951_s29, %s951_s29, %s952_s30  }
  0x24   :  { %s867_s3 = scalar_lea.vmem %s47_s16, 1024  ;;  %p872_p2 = scmp.lt.s32.totalorder %s47_s16, %s47_s16 }
  0x25   :  { %p868_p1 = scmp.ne.s32.totalorder %s47_s16, %s867_s3  ;;  %p873_p3 = scmp.lt.s32.totalorder %s867_s3, %s867_s3 }
  0x27   :  { %p874_p4 = por %p873_p3, %p872_p2 }
  0x29   :  { %p875_p5 = pnand %p874_p4, %p868_p1 }
  0x2b   :  { %878 = shalt.err (!%p875_p5)
}
  0x2c   :  { %52 = dma.hbm_to_vmem [thread:$0]  %s1057_s2, 1024, %s47_s16, [#allocation6], %s951_s29, %s951_s29, %s952_s30  }
  0x2d   :  { %s955_s21 = smov [#allocation10]   ;;  %s956_s23 = smov [#allocation11]  }
  0x2e   :  { %s71_s22 = sshll.u32 %s955_s21, 4  ;;  %s83_s24 = sshll.u32 %s956_s23, 4  ;;  %s72_s22 = int_to_ptr.vmem [resolvable:$true] %s71_s22  ;;  %s84_s24 = int_to_ptr.vmem [resolvable:$true] %s83_s24 }
  0x2f   :  { %s887_s0 = scalar_lea.vmem %s72_s22, 128  ;;  %p892_p7 = scmp.lt.s32.totalorder %s72_s22, %s72_s22 }
  0x30   :  { %p888_p6 = scmp.ne.s32.totalorder %s72_s22, %s887_s0  ;;  %p893_p8 = scmp.lt.s32.totalorder %s887_s0, %s887_s0 }
  0x32   :  { %p894_p9 = por %p893_p8, %p892_p7 }
  0x34   :  { %p895_p10 = pnand %p894_p9, %p888_p6 }
  0x36   :  { %898 = shalt.err (!%p895_p10)
}
  0x37   :  { %74 = dma.hbm_to_vmem [thread:$0]  %s1059_s4, 128, %s72_s22, [#allocation9]  }
  0x38   :  { %s907_s27 = scalar_lea.vmem %s84_s24, 128  ;;  %p912_p12 = scmp.lt.s32.totalorder %s84_s24, %s84_s24 }
  0x39   :  { %p908_p11 = scmp.ne.s32.totalorder %s84_s24, %s907_s27  ;;  %p913_p13 = scmp.lt.s32.totalorder %s907_s27, %s907_s27 }
  0x3b   :  { %p914_p0 = por %p913_p13, %p912_p12 }
  0x3d   :  { %p915_p1 = pnand %p914_p0, %p908_p11 }
  0x3f   :  { %918 = shalt.err (!%p915_p1)
}
  0x40   :  { %86 = dma.hbm_to_vmem [thread:$0]  %s1061_s6, 128, %s84_s24, [#allocation12]  }
  0x41   :  { %939 = dma.done.wait [#allocation3], 256  }
  0x42   :  { %940 = vsyncadd [#allocation3], 4294967040 }
  0x43   :  { %941 = dma.done.wait [#allocation6], 2048  }
  0x44   :  { %942 = vsyncadd [#allocation6], 4294965248 }
  0x45   :  { %943 = dma.done.wait [#allocation9], 1152  }
  0x46   :  { %944 = vsyncadd [#allocation9], 4294966144 }
  0x47   :  { %945 = dma.done.wait [#allocation12], 128  }
  0x48   :  { %946 = vsyncadd [#allocation12], 4294967168  ;;  %v769_v0 = vld [vmem:[#allocation5 + $0x38] sm:$0xff]   ;;  %v770_v1 = vld [vmem:[#allocation5 + $0x30] sm:$0xff]   ;;  %v240_v18 = vlaneseq }
  0x49   :  { %698 = vmatprep.subr.bf16.mxu0 %v769_v0  ;;  %v771_v2 = vld [vmem:[#allocation5 + $0x28] sm:$0xff]   ;;  %v772_v3 = vld [vmem:[#allocation5 + $0x20] sm:$0xff]   ;;  %v777_v4 = vld [vmem:[#allocation2] sm:$0xff]  }
  0x4a   :  { %699 = vmatpush3.bf16.msra.mxu0 %v769_v0  ;;  %v773_v5 = vld [vmem:[#allocation5 + $0x18] sm:$0xff]   ;;  %714 = vmatprep.mubr.bf16.mxu0 %v777_v4  ;;  %v774_v6 = vld [vmem:[#allocation5 + $0x10] sm:$0xff]   ;;  %v775_v7 = vld [vmem:[#allocation5 + $0x8] sm:$0xff]   ;;  %v241_v19 = vshrl.u32 %v240_v18, 7 }
  0x4b   :  { %700 = vmatprep.subr.bf16.mxu0 %v770_v1  ;;  %v776_v8 = vld [vmem:[#allocation5] sm:$0xff]   ;;  %v778_v9 = vld [vmem:[#allocation2 + $0x8] sm:$0xff]   ;;  %v780_v11 = vld [vmem:[#allocation7 + $0x30] sm:$0xff]  }
  0x4c   :  { %v779_v10 = vld [vmem:[#allocation7 + $0x38] sm:$0xff]   ;;  %v781_v12 = vld [vmem:[#allocation7 + $0x28] sm:$0xff]   ;;  %v782_v13 = vld [vmem:[#allocation7 + $0x20] sm:$0xff]   ;;  %v1030_v22 = vadd.s32 16, %v241_v19  ;;  %v1035_v55 = vsub.s32 0, %v241_v19 }
  0x4d   :  { %718 = vmatprep.subr.bf16.mxu1 %v779_v10  ;;  %v783_v14 = vld [vmem:[#allocation7 + $0x18] sm:$0xff]   ;;  %v784_v15 = vld [vmem:[#allocation7 + $0x10] sm:$0xff]   ;;  %v785_v16 = vld [vmem:[#allocation7 + $0x8] sm:$0xff]  }
  0x4e   :  { %701 = vmatpush3.bf16.msra.mxu0 %v770_v1  ;;  %719 = vmatpush3.bf16.msra.mxu1 %v779_v10  ;;  %v786_v17 = vld [vmem:[#allocation7] sm:$0xff]   ;;  %vm247_vm0 = vcmp.lt.s32.totalorder %v1030_v22, 20  ;;  %v791_v18 = vld [vmem:[#allocation8 + $0x18] sm:$0xff]   ;;  %v792_v19 = vld [vmem:[#allocation8 + $0x10] sm:$0xff]  }
  0x4f   :  { %702 = vmatprep.subr.bf16.mxu0 %v771_v2  ;;  %720 = vmatprep.subr.bf16.mxu1 %v780_v11  ;;  %v639_v21 = vld [vmem:[#allocation10] ss:$0 sm:$0xff]  ;;  %v287_v54 = vld [vmem:[#allocation10 + $0x1] sm:$0x1]  ;;  %v291_v58 = vld [vmem:[#allocation10 + $0x2] sm:$0x1] }
  0x52   :  { %703 = vmatpush3.bf16.msra.mxu0 %v771_v2  ;;  %721 = vmatpush3.bf16.msra.mxu1 %v780_v11 }
  0x53   :  { %704 = vmatprep.subr.bf16.mxu0 %v772_v3  ;;  %722 = vmatprep.subr.bf16.mxu1 %v781_v12 }
  0x56   :  { %705 = vmatpush3.bf16.msra.mxu0 %v772_v3  ;;  %723 = vmatpush3.bf16.msra.mxu1 %v781_v12 }
  0x57   :  { %706 = vmatprep.subr.bf16.mxu0 %v773_v5  ;;  %724 = vmatprep.subr.bf16.mxu1 %v782_v13 }
  0x5a   :  { %707 = vmatpush3.bf16.msra.mxu0 %v773_v5  ;;  %725 = vmatpush3.bf16.msra.mxu1 %v782_v13 }
  0x5b   :  { %708 = vmatprep.subr.bf16.mxu0 %v774_v6  ;;  %726 = vmatprep.subr.bf16.mxu1 %v783_v14 }
  0x5e   :  { %709 = vmatpush3.bf16.msra.mxu0 %v774_v6  ;;  %727 = vmatpush3.bf16.msra.mxu1 %v783_v14  ;;  %v787_v14 = vld [vmem:[#allocation8 + $0x38] sm:$0xff]  }
  0x5f   :  { %710 = vmatprep.subr.bf16.mxu0 %v775_v7  ;;  %728 = vmatprep.subr.bf16.mxu1 %v784_v15 }
  0x62   :  { %711 = vmatpush3.bf16.msra.mxu0 %v775_v7  ;;  %729 = vmatpush3.bf16.msra.mxu1 %v784_v15  ;;  %v788_v15 = vld [vmem:[#allocation8 + $0x30] sm:$0xff]  }
  0x63   :  { %712 = vmatprep.subr.bf16.mxu0 %v776_v8  ;;  %730 = vmatprep.subr.bf16.mxu1 %v785_v16 }
  0x66   :  { %713 = vmatpush3.bf16.msra.mxu0 %v776_v8  ;;  %731 = vmatpush3.bf16.msra.mxu1 %v785_v16  ;;  %v789_v16 = vld [vmem:[#allocation8 + $0x28] sm:$0xff]  }
  0x67   :  { %732 = vmatprep.subr.bf16.mxu1 %v786_v17  ;;  %738 = vmatprep.subr.bf16.mxu0 %v787_v14 }
  0x69   :  { %715 = vmatmul.mubr.bf16.vlgmr.msra.gmra.mxu0 %v778_v9 }
  0x6a   :  { %733 = vmatpush3.bf16.msra.mxu1 %v786_v17  ;;  %739 = vmatpush3.bf16.msra.mxu0 %v787_v14  ;;  %v790_v17 = vld [vmem:[#allocation8 + $0x20] sm:$0xff]  }
  0x6b   :  { %740 = vmatprep.subr.bf16.mxu0 %v788_v15 }
  0x6e   :  { %741 = vmatpush3.bf16.msra.mxu0 %v788_v15  ;;  %v659_v15 = vld [vmem:[#allocation11] ss:$0 sm:$0xff] }
  0x6f   :  { %742 = vmatprep.subr.bf16.mxu0 %v789_v16 }
  0x72   :  { %743 = vmatpush3.bf16.msra.mxu0 %v789_v16 }
  0x73   :  { %744 = vmatprep.subr.bf16.mxu0 %v790_v17 }
  0x76   :  { %745 = vmatpush3.bf16.msra.mxu0 %v790_v17 }
  0x77   :  { %746 = vmatprep.subr.bf16.mxu0 %v791_v18 }
  0x7a   :  { %747 = vmatpush3.bf16.msra.mxu0 %v791_v18 }
  0x7b   :  { %748 = vmatprep.subr.bf16.mxu0 %v792_v19 }
  0x7e   :  { %749 = vmatpush3.bf16.msra.mxu0 %v792_v19 }
 0x129   :  { %v716_v20 = vpop.f32.mrf.mxu0 }
 0x12a   :  { %v234_v24 = vadd.f32 %v716_v20, %v639_v21  ;;  %v793_v20 = vld [vmem:[#allocation8 + $0x8] sm:$0xff]  }
 0x12b   :  { %v225_v23 = vpop.f32.mrf.mxu0  ;;  %750 = vmatprep.subr.bf16.mxu0 %v793_v20 }
 0x12c   :  { %v226_v26 = vadd.f32 %v639_v21, %v225_v23  ;;  %v259_v29 = vsel %vm247_vm0, %v234_v24, 0.0  ;;  %751 = vmatpush3.bf16.msra.mxu0 %v793_v20 }
 0x12d   :  { %v717_v25 = vpop.f32.mrf.mxu0  ;;  %v273_v33 = vmul.f32 %v259_v29, %v259_v29 }
 0x12e   :  { %v271_v30 = vmul.f32 %v226_v26, %v226_v26  ;;  %v237_v61 = vadd.f32 %v717_v25, %v639_v21 }
 0x12f   :  { %v228_v27 = vpop.f32.mrf.mxu0 }
 0x130   :  { %v229_v28 = vadd.f32 %v639_v21, %v228_v27  ;;  %v794_v21 = vld [vmem:[#allocation8] sm:$0xff]  }
 0x131   :  { %752 = vmatprep.subr.bf16.mxu0 %v794_v21 }
 0x132   :  { %v261_v31 = vadd.f32 %v229_v28, %v226_v26  ;;  %v272_v32 = vmul.f32 %v229_v28, %v229_v28  ;;  %753 = vmatpush3.bf16.msra.mxu0 %v794_v21 }
 0x134   :  { %v262_v34 = vadd.f32 %v261_v31, %v259_v29  ;;  %v275_v35 = vadd.f32 %v272_v32, %v271_v30 }
 0x136   :  { %v264_v36 = vrot.slane %v262_v34, 4  ;;  %v276_v37 = vadd.f32 %v275_v35, %v273_v33 }
 0x138   :  { %v265_v38 = vadd.f32 %v264_v36, %v262_v34  ;;  %v278_v39 = vrot.slane %v276_v37, 4 }
 0x13a   :  { %v266_v40 = vrot.slane %v265_v38, 2  ;;  %v279_v41 = vadd.f32 %v278_v39, %v276_v37 }
 0x13c   :  { %v267_v42 = vadd.f32 %v266_v40, %v265_v38  ;;  %v280_v43 = vrot.slane %v279_v41, 2 }
 0x13e   :  { %v268_v44 = vrot.slane %v267_v42, 1  ;;  %v281_v45 = vadd.f32 %v280_v43, %v279_v41 }
 0x140   :  { %v269_v46 = vadd.f32 %v268_v44, %v267_v42  ;;  %v282_v47 = vrot.slane %v281_v45, 1 }
 0x142   :  { %v270_v48 = vmul.f32 0.05, %v269_v46  ;;  %v283_v49 = vadd.f32 %v282_v47, %v281_v45 }
 0x144   :  { %v284_v50 = vmul.f32 0.05, %v283_v49  ;;  %v285_v51 = vmul.f32 %v270_v48, %v270_v48 }
 0x146   :  { %v286_v52 = vsub.f32 %v284_v50, %v285_v51 }
 0x148   :  { %v288_v53 = vadd.f32 1e-05, %v286_v52 }
 0x14a   :  { %795 = vrsqrt.f32 %v288_v53 }
 0x157   :  { %v796_v56 = vpop.eup %795 }
 0x158   :  { %v290_v57 = vmul.f32 %v796_v56, %v287_v54  ;;  %v464_v56 = vld [vmem:[%s1060_s5 + $0x1] sm:$0x1] }
 0x15a   :  { %v292_v59 = vmul.f32 %v290_v57, %v270_v48  ;;  %v297_v60 = vrot.slane %v290_v57, %v1035_v55 }
 0x15c   :  { %v293_v62 = vsub.f32 %v291_v58, %v292_v59  ;;  %v298_v63 = vmul.f32 %v297_v60, %v226_v26  ;;  %v299_v0 = vmul.f32 %v297_v60, %v229_v28  ;;  %v300_v2 = vmul.f32 %v297_v60, %v234_v24  ;;  %v650_v24 = vld [vmem:[%s1060_s5] ss:$0 sm:$0xff]  ;;  %v468_v59 = vld [vmem:[%s1060_s5 + $0x2] sm:$0x1]  ;;  %s957_s5 = smov [#allocation13]  }
 0x15d   :  { %v301_v3 = vmul.f32 %v297_v60, %v237_v61  ;;  %s624_s10 = sshll.u32 %s957_s5, 4  ;;  %s625_s10 = int_to_ptr.vmem [resolvable:$true] %s624_s10 }
 0x15e   :  { %v305_v1 = vrot.slane %v293_v62, %v1035_v55  ;;  %s919_s11 = scalar_lea.vmem %s625_s10, 512  ;;  %p924_p3 = scmp.lt.s32.totalorder %s625_s10, %s625_s10 }
 0x15f   :  { %p920_p2 = scmp.ne.s32.totalorder %s625_s10, %s919_s11  ;;  %p925_p4 = scmp.lt.s32.totalorder %s919_s11, %s919_s11 }
 0x160   :  { %v306_v4 = vadd.f32 %v305_v1, %v298_v63  ;;  %v307_v5 = vadd.f32 %v305_v1, %v299_v0  ;;  %v308_v6 = vadd.f32 %v305_v1, %v300_v2  ;;  %v309_v7 = vadd.f32 %v305_v1, %v301_v3 }
 0x161   :  { %p926_p5 = por %p925_p4, %p924_p3 }
 0x162   :  { %v310_v8 = vmax.f32 %v306_v4, 0.0  ;;  %v311_v9 = vmax.f32 %v307_v5, 0.0  ;;  %v312_v10 = vmax.f32 %v308_v6, 0.0  ;;  %v313_v11 = vmax.f32 %v309_v7, 0.0 }
 0x163   :  { %p927_p6 = pnand %p926_p5, %p920_p2 }
 0x164   :  { %v314_v12 = vpack.c.bf16 %v311_v9, %v310_v8  ;;  %v315_v13 = vpack.c.bf16 %v313_v11, %v312_v10 }
 0x166   :  { %734 = vmatprep.mubr.bf16.mxu1 %v314_v12 }
 0x167   :  { %735 = vmatmul.mubr.bf16.vlgmr.msra.gmra.mxu1 %v315_v13 }
 0x227   :  { %v736_v23 = vpop.f32.mrf.mxu1 }
 0x228   :  { %v428_v26 = vadd.f32 %v736_v23, %v650_v24 }
 0x229   :  { %v419_v25 = vpop.f32.mrf.mxu1 }
 0x22a   :  { %v420_v28 = vadd.f32 %v650_v24, %v419_v25  ;;  %v436_v31 = vsel %vm247_vm0, %v428_v26, 0.0 }
 0x22b   :  { %v737_v27 = vpop.f32.mrf.mxu1  ;;  %v450_v35 = vmul.f32 %v436_v31, %v436_v31 }
 0x22c   :  { %v448_v32 = vmul.f32 %v420_v28, %v420_v28  ;;  %v431_v62 = vadd.f32 %v737_v27, %v650_v24 }
 0x22d   :  { %v422_v29 = vpop.f32.mrf.mxu1 }
 0x22e   :  { %v423_v30 = vadd.f32 %v650_v24, %v422_v29 }
 0x230   :  { %v438_v33 = vadd.f32 %v423_v30, %v420_v28  ;;  %v449_v34 = vmul.f32 %v423_v30, %v423_v30 }
 0x232   :  { %v439_v36 = vadd.f32 %v438_v33, %v436_v31  ;;  %v452_v37 = vadd.f32 %v449_v34, %v448_v32 }
 0x234   :  { %v441_v38 = vrot.slane %v439_v36, 4  ;;  %v453_v39 = vadd.f32 %v452_v37, %v450_v35 }
 0x236   :  { %v442_v40 = vadd.f32 %v441_v38, %v439_v36  ;;  %v455_v41 = vrot.slane %v453_v39, 4 }
 0x238   :  { %v443_v42 = vrot.slane %v442_v40, 2  ;;  %v456_v43 = vadd.f32 %v455_v41, %v453_v39 }
 0x23a   :  { %v444_v44 = vadd.f32 %v443_v42, %v442_v40  ;;  %v457_v45 = vrot.slane %v456_v43, 2 }
 0x23c   :  { %v445_v46 = vrot.slane %v444_v44, 1  ;;  %v458_v47 = vadd.f32 %v457_v45, %v456_v43 }
 0x23e   :  { %v446_v48 = vadd.f32 %v445_v46, %v444_v44  ;;  %v459_v49 = vrot.slane %v458_v47, 1 }
 0x240   :  { %v447_v22 = vmul.f32 0.05, %v446_v48  ;;  %v460_v50 = vadd.f32 %v459_v49, %v458_v47 }
 0x242   :  { %v461_v51 = vmul.f32 0.05, %v460_v50  ;;  %v462_v52 = vmul.f32 %v447_v22, %v447_v22 }
 0x244   :  { %v463_v53 = vsub.f32 %v461_v51, %v462_v52 }
 0x246   :  { %v465_v54 = vadd.f32 1e-05, %v463_v53 }
 0x248   :  { %797 = vrsqrt.f32 %v465_v54 }
 0x255   :  { %v798_v57 = vpop.eup %797 }
 0x256   :  { %v467_v58 = vmul.f32 %v798_v57, %v464_v56 }
 0x258   :  { %v469_v60 = vmul.f32 %v467_v58, %v447_v22  ;;  %v474_v61 = vrot.slane %v467_v58, %v1035_v55 }
 0x25a   :  { %v470_v63 = vsub.f32 %v468_v59, %v469_v60  ;;  %v476_v0 = vmul.f32 %v474_v61, %v423_v30  ;;  %v475_v1 = vmul.f32 %v474_v61, %v420_v28  ;;  %v477_v3 = vmul.f32 %v474_v61, %v428_v26 }
 0x25b   :  { %v478_v4 = vmul.f32 %v474_v61, %v431_v62 }
 0x25c   :  { %v482_v2 = vrot.slane %v470_v63, %v1035_v55 }
 0x25e   :  { %v483_v5 = vadd.f32 %v482_v2, %v475_v1  ;;  %v484_v6 = vadd.f32 %v482_v2, %v476_v0  ;;  %v485_v7 = vadd.f32 %v482_v2, %v477_v3  ;;  %v486_v8 = vadd.f32 %v482_v2, %v478_v4 }
 0x260   :  { %v487_v9 = vmax.f32 %v483_v5, 0.0  ;;  %v488_v10 = vmax.f32 %v484_v6, 0.0  ;;  %v489_v11 = vmax.f32 %v485_v7, 0.0  ;;  %v490_v12 = vmax.f32 %v486_v8, 0.0 }
 0x262   :  { %v491_v13 = vpack.c.bf16 %v488_v10, %v487_v9  ;;  %v492_v14 = vpack.c.bf16 %v490_v12, %v489_v11 }
 0x264   :  { %754 = vmatprep.mubr.bf16.mxu0 %v491_v13 }
 0x265   :  { %755 = vmatmul.mubr.bf16.vlgmr.msra.gmra.mxu0 %v492_v14 }
 0x325   :  { %v756_v16 = vpop.f32.mrf.mxu0 }
 0x326   :  { %v605_v17 = vadd.f32 %v756_v16, %v659_v15 }
 0x327   :  { %v596_v18 = vpop.f32.mrf.mxu0 }
 0x328   :  { %v613_v19 = vmax.f32 %v605_v17, 0.0  ;;  %v597_v55 = vadd.f32 %v659_v15, %v596_v18 }
 0x329   :  { %v757_v20 = vpop.f32.mrf.mxu0 }
 0x32a   :  { %617 = vst [vmem:[#allocation13 + $0x10] sm:$0xff] %v613_v19  ;;  %v611_v21 = vmax.f32 %v597_v55, 0.0  ;;  %v608_v23 = vadd.f32 %v757_v20, %v659_v15 }
 0x32b   :  { %v599_v24 = vpop.f32.mrf.mxu0 }
 0x32c   :  { %615 = vst [vmem:[#allocation13] sm:$0xff] %v611_v21  ;;  %v614_v25 = vmax.f32 %v608_v23, 0.0  ;;  %v600_v26 = vadd.f32 %v659_v15, %v599_v24 }
 0x32e   :  { %618 = vst [vmem:[#allocation13 + $0x18] sm:$0xff] %v614_v25  ;;  %v612_v27 = vmax.f32 %v600_v26, 0.0 }
 0x330   :  { %616 = vst [vmem:[#allocation13 + $0x8] sm:$0xff] %v612_v27 }
 0x331   :  { %930 = shalt.err (!%p927_p6)
}
 0x332   :  { %s958_s12 = smov 128   ;;  %s959_s13 = smov 8  }
 0x333   :  { %630 = dma.vmem_to_hbm [thread:$0]  %s625_s10, 512, %s1062_s7, [#allocation4], %s958_s12, %s958_s12, %s959_s13  }
 0x334   :  { %947 = dma.done.wait [#allocation4], 512  }
 0x335   :  { %948 = vsyncadd [#allocation4], 4294966784 }
 0x336   :  { %634 = vsyncpa [#allocation3], 1 }
 0x337   :  { %635 = vsyncpa [#allocation6], 1 }
 0x338   :  { %636 = vsyncpa [#allocation9], 1 }
 0x339   :  { %637 = vsyncpa [#allocation12], 1 }
 0x33a   :  { %638 = vsyncpa [#allocation4], 1 }

</bundles_post_ra>
